<compile_context>
chip_gen: v7x
topology: tpu7x:2x2x1
jax: 0.10.0
libtpu: 0.0.40
codegen_flags: <defaults>
</compile_context>

<pallas_src>
import functools

import jax
import jax.numpy as jnp
from jax import lax
from jax.experimental import pallas as pl
from jax.experimental.pallas import tpu as pltpu


def _convlstm_kernel(x_ref, c_ref, w_ref, b_ref, h_out_ref, c_out_ref,
                     *, H, W, K, CH, CR):
    """One batch element per grid step.

    x_ref     : (1, (H+2p)*W, K*C)  bf16  dx-unfolded, row-flattened padded input
    c_ref     : (1, H*W, CH)        f32   previous cell state
    w_ref     : (K, K*C, 4*CH)      bf16  w_ref[dy] = tap matrix for row-shift dy
    b_ref     : (1, 4*CH)           f32   conv bias
    h_out_ref : (1, H*W, CH)
    c_out_ref : (1, H*W, CH)
    """
    nchunks = (H * W) // CR
    w_aligned = (W % 8) == 0

    def chunk_body(t, carry):
        row0 = pl.multiple_of(t * CR, CR)

        # --- conv as K deep matmuls: (CR, K*C) @ (K*C, 4*CH), f32 accumulate.
        def tap(dy):
            start = row0 + dy * W
            if w_aligned:
                start = pl.multiple_of(start, 8)
            patch = x_ref[0, pl.ds(start, CR), :]            # (CR, K*C) bf16
            return jnp.dot(patch, w_ref[dy],
                           preferred_element_type=jnp.float32)

        acc = tap(0)
        for dy in range(1, K):
            acc = acc + tap(dy)
        acc = acc + b_ref[...]                               # (1, 4*CH) broadcast

        # --- gates.  Lane order matches torch.chunk(4, dim=1): i, f, o, g.
        sg = jax.nn.sigmoid(acc[:, :3 * CH])                 # one 96-lane pass
        g_g = jnp.tanh(acc[:, 3 * CH:])
        i_g = sg[:, 0 * CH:1 * CH]
        f_g = sg[:, 1 * CH:2 * CH]
        o_g = sg[:, 2 * CH:3 * CH]

        prev_c = c_ref[0, pl.ds(row0, CR), :].astype(jnp.float32)
        cell = f_g * prev_c + i_g * g_g
        hidden = o_g * jnp.tanh(cell)

        h_out_ref[0, pl.ds(row0, CR), :] = hidden.astype(h_out_ref.dtype)
        c_out_ref[0, pl.ds(row0, CR), :] = cell.astype(c_out_ref.dtype)
        return carry

    lax.fori_loop(0, nchunks, chunk_body, 0)


def convlstm_forward(x_nchw, weight_oihw, bias, hidden_size, kernel_size,
                     prev_state=None):
    """ConvLSTM single step.  Inputs/outputs use NCHW like the PyTorch module."""
    B, CIN, H, W = x_nchw.shape
    K = kernel_size
    pad = K // 2
    CH = hidden_size
    C = CIN + CH
    KC = K * C
    Hp = H + 2 * pad
    out_dtype = x_nchw.dtype

    if prev_state is None:
        prev_h = jnp.zeros((B, CH, H, W), x_nchw.dtype)
        prev_c = jnp.zeros((B, CH, H, W), x_nchw.dtype)
    else:
        prev_h, prev_c = prev_state

    # ---------- wrapper-side layout glue (XLA) ----------
    # NCHW -> NHWC so channels sit on the TPU lane axis.
    x_nhwc = jnp.transpose(x_nchw, (0, 2, 3, 1))
    h_nhwc = jnp.transpose(prev_h, (0, 2, 3, 1))
    c_nhwc = jnp.transpose(prev_c, (0, 2, 3, 1))

    stacked = jnp.concatenate([x_nhwc, h_nhwc], axis=-1)            # (B,H,W,C)
    stacked_pad = jnp.pad(stacked, ((0, 0), (pad, pad), (pad, pad), (0, 0)))

    # dx-unfold: channel index = dx*C + c, then flatten rows so the kernel only
    # ever takes contiguous, aligned second-minor-axis slices.
    x_unf = jnp.concatenate(
        [stacked_pad[:, :, dx:dx + W, :] for dx in range(K)], axis=-1)
    x_flat = x_unf.reshape(B, Hp * W, KC).astype(jnp.bfloat16)

    c_flat = c_nhwc.reshape(B, H * W, CH).astype(jnp.float32)

    # OIHW -> (K, K*C, 4*CH); row index within each dy tap = dx*C + c.
    w_hwio = jnp.transpose(weight_oihw, (2, 3, 1, 0))               # (K,K,C,4CH)
    w3 = w_hwio.reshape(K, KC, 4 * CH).astype(jnp.bfloat16)
    b2d = bias.reshape(1, 4 * CH).astype(jnp.float32)

    # Spatial chunk (in flattened rows): a multiple of W, ~128 rows, divides H*W.
    TH = max(1, min(H, max(1, 128 // W)))
    while H % TH:
        TH -= 1
    CR = TH * W

    kernel = functools.partial(_convlstm_kernel, H=H, W=W, K=K, CH=CH, CR=CR)

    h_out, c_out = pl.pallas_call(
        kernel,
        out_shape=(jax.ShapeDtypeStruct((B, H * W, CH), out_dtype),
                   jax.ShapeDtypeStruct((B, H * W, CH), out_dtype)),
        grid_spec=pltpu.PrefetchScalarGridSpec(
            num_scalar_prefetch=0,
            grid=(B,),
            in_specs=[
                pl.BlockSpec((1, Hp * W, KC), lambda b: (b, 0, 0)),
                pl.BlockSpec((1, H * W, CH), lambda b: (b, 0, 0)),
                pl.BlockSpec((K, KC, 4 * CH), lambda b: (0, 0, 0)),
                pl.BlockSpec((1, 4 * CH), lambda b: (0, 0)),
            ],
            out_specs=[
                pl.BlockSpec((1, H * W, CH), lambda b: (b, 0, 0)),
                pl.BlockSpec((1, H * W, CH), lambda b: (b, 0, 0)),
            ],
        ),
        compiler_params=pltpu.CompilerParams(
            dimension_semantics=("parallel",)),
    )(x_flat, c_flat, w3, b2d)

    # Back to the PyTorch module's NCHW convention.
    hidden = jnp.transpose(h_out.reshape(B, H, W, CH), (0, 3, 1, 2))
    cell = jnp.transpose(c_out.reshape(B, H, W, CH), (0, 3, 1, 2))
    return hidden, cell


def _reference(x_nchw, weight_oihw, bias, hidden_size, kernel_size):
    """Pure-JAX f32 reference (lax.conv) for correctness checking."""
    B, CIN, H, W = x_nchw.shape
    pad = kernel_size // 2
    CH = hidden_size
    prev_h = jnp.zeros((B, CH, H, W), x_nchw.dtype)
    prev_c = jnp.zeros((B, CH, H, W), x_nchw.dtype)
    stacked = jnp.concatenate([x_nchw, prev_h], axis=1)
    gates = lax.conv_general_dilated(
        stacked, weight_oihw, window_strides=(1, 1),
        padding=((pad, pad), (pad, pad)),
        dimension_numbers=("NCHW", "OIHW", "NCHW"))
    gates = gates + bias.reshape(1, 4 * CH, 1, 1)
    i_g, f_g, o_g, g_g = jnp.split(gates, 4, axis=1)
    i_g = jax.nn.sigmoid(i_g)
    f_g = jax.nn.sigmoid(f_g)
    o_g = jax.nn.sigmoid(o_g)
    g_g = jnp.tanh(g_g)
    cell = f_g * prev_c + i_g * g_g
    hidden = o_g * jnp.tanh(cell)
    return hidden, cell


if __name__ == "__main__":
    input_size = 4
    hidden_size = 32
    kernel_size = 3

    B, H, W = 2, 16, 16
    C_total = input_size + hidden_size

    key = jax.random.PRNGKey(0)
    kx, kw, kb = jax.random.split(key, 3)

    # Deterministic parameter init (Conv2d shapes from the module's __init__).
    fan_in = C_total * kernel_size * kernel_size
    bound = 1.0 / (fan_in ** 0.5)
    weight = jax.random.uniform(
        kw, (4 * hidden_size, C_total, kernel_size, kernel_size),
        jnp.float32, -bound, bound)
    bias = jax.random.uniform(kb, (4 * hidden_size,), jnp.float32, -bound, bound)

    x = jax.random.normal(kx, (B, input_size, H, W), jnp.float32)

    hidden, cell = convlstm_forward(x, weight, bias, hidden_size, kernel_size)
    jax.block_until_ready((hidden, cell))

    h_ref, c_ref = _reference(x, weight, bias, hidden_size, kernel_size)
    assert hidden.shape == (B, hidden_size, H, W)
    assert cell.shape == (B, hidden_size, H, W)
    # bf16 matmul operands -> looser tolerance than the pure-f32 version.
    assert jnp.allclose(hidden, h_ref, atol=2e-2), "hidden mismatch"
    assert jnp.allclose(cell, c_ref, atol=2e-2), "cell mismatch"

    print("KERNEL_OK")
</pallas_src>

<mosaic_0001>
module attributes {stable_mosaic.version = 11 : i64} {
  func.func @_convlstm_kernel(%arg0: i32, %arg1: memref<1x288x108xbf16, #tpu.memory_space<vmem>>, %arg2: memref<1x256x32xf32, #tpu.memory_space<vmem>>, %arg3: memref<3x108x128xbf16, #tpu.memory_space<vmem>>, %arg4: memref<1x128xf32, #tpu.memory_space<vmem>>, %arg5: memref<1x256x32xf32, #tpu.memory_space<vmem>>, %arg6: memref<1x256x32xf32, #tpu.memory_space<vmem>>) attributes {dimension_semantics = [#tpu.dimension_semantics<parallel>], iteration_bounds = array<i64: 2>, scalar_prefetch = 0 : i64, scratch_operands = 0 : i64, tpu.core_type = #tpu.core_type<tc>, window_params = [{transform_indices = @transform_0, window_bounds = array<i64: 1, 288, 108>}, {transform_indices = @transform_1, window_bounds = array<i64: 1, 256, 32>}, {pipeline_mode = #tpu.pipeline_mode<synchronous>, transform_indices = @transform_2, window_bounds = array<i64: 3, 108, 128>}, {pipeline_mode = #tpu.pipeline_mode<synchronous>, transform_indices = @transform_3, window_bounds = array<i64: 1, 128>}, {transform_indices = @transform_4, window_bounds = array<i64: 1, 256, 32>}, {transform_indices = @transform_5, window_bounds = array<i64: 1, 256, 32>}]} {
    %c0_i32 = arith.constant 0 : i32
    %c2_i32 = arith.constant 2 : i32
    %0 = arith.addi %c0_i32, %c2_i32 : i32
    %c1_i32 = arith.constant 1 : i32
    scf.for %arg7 = %c0_i32 to %0 step %c1_i32  : i32 {
      %c128_i32 = arith.constant 128 : i32
      %1 = arith.muli %arg7, %c128_i32 : i32
      %2 = tpu.assume_multiple %1, 128 : i32
      %c0_i32_1 = arith.constant 0 : i32
      %3 = arith.addi %2, %c0_i32_1 : i32
      %4 = tpu.assume_multiple %3, 8 : i32
      %c0 = arith.constant 0 : index
      %5 = arith.index_cast %4 : i32 to index
      %c0_2 = arith.constant 0 : index
      %6 = vector.load %arg1[%c0, %5, %c0_2] : memref<1x288x108xbf16, #tpu.memory_space<vmem>>, vector<1x128x108xbf16>
      %7 = vector.shape_cast %6 : vector<1x128x108xbf16> to vector<128x108xbf16>
      %c0_3 = arith.constant 0 : index
      %c0_4 = arith.constant 0 : index
      %c0_5 = arith.constant 0 : index
      %8 = vector.load %arg3[%c0_3, %c0_4, %c0_5] : memref<3x108x128xbf16, #tpu.memory_space<vmem>>, vector<1x108x128xbf16>
      %9 = vector.shape_cast %8 : vector<1x108x128xbf16> to vector<108x128xbf16>
      %cst = arith.constant dense<0.000000e+00> : vector<128x128xf32>
      %10 = tpu.matmul %7, %9, %cst {dimension_numbers = #tpu.dot_dimension_numbers<[1], [0], [0], [1], [0, 0, 1, 1], [], []>} : vector<128x108xbf16>, vector<108x128xbf16>, vector<128x128xf32> -> vector<128x128xf32>
      %c16_i32 = arith.constant 16 : i32
      %11 = arith.addi %2, %c16_i32 : i32
      %12 = tpu.assume_multiple %11, 8 : i32
      %c0_6 = arith.constant 0 : index
      %13 = arith.index_cast %12 : i32 to index
      %c0_7 = arith.constant 0 : index
      %14 = vector.load %arg1[%c0_6, %13, %c0_7] : memref<1x288x108xbf16, #tpu.memory_space<vmem>>, vector<1x128x108xbf16>
      %15 = vector.shape_cast %14 : vector<1x128x108xbf16> to vector<128x108xbf16>
      %c1 = arith.constant 1 : index
      %c0_8 = arith.constant 0 : index
      %c0_9 = arith.constant 0 : index
      %16 = vector.load %arg3[%c1, %c0_8, %c0_9] : memref<3x108x128xbf16, #tpu.memory_space<vmem>>, vector<1x108x128xbf16>
      %17 = vector.shape_cast %16 : vector<1x108x128xbf16> to vector<108x128xbf16>
      %cst_10 = arith.constant dense<0.000000e+00> : vector<128x128xf32>
      %18 = tpu.matmul %15, %17, %cst_10 {dimension_numbers = #tpu.dot_dimension_numbers<[1], [0], [0], [1], [0, 0, 1, 1], [], []>} : vector<128x108xbf16>, vector<108x128xbf16>, vector<128x128xf32> -> vector<128x128xf32>
      %19 = arith.addf %10, %18 : vector<128x128xf32>
      %c32_i32 = arith.constant 32 : i32
      %20 = arith.addi %2, %c32_i32 : i32
      %21 = tpu.assume_multiple %20, 8 : i32
      %c0_11 = arith.constant 0 : index
      %22 = arith.index_cast %21 : i32 to index
      %c0_12 = arith.constant 0 : index
      %23 = vector.load %arg1[%c0_11, %22, %c0_12] : memref<1x288x108xbf16, #tpu.memory_space<vmem>>, vector<1x128x108xbf16>
      %24 = vector.shape_cast %23 : vector<1x128x108xbf16> to vector<128x108xbf16>
      %c2 = arith.constant 2 : index
      %c0_13 = arith.constant 0 : index
      %c0_14 = arith.constant 0 : index
      %25 = vector.load %arg3[%c2, %c0_13, %c0_14] : memref<3x108x128xbf16, #tpu.memory_space<vmem>>, vector<1x108x128xbf16>
      %26 = vector.shape_cast %25 : vector<1x108x128xbf16> to vector<108x128xbf16>
      %cst_15 = arith.constant dense<0.000000e+00> : vector<128x128xf32>
      %27 = tpu.matmul %24, %26, %cst_15 {dimension_numbers = #tpu.dot_dimension_numbers<[1], [0], [0], [1], [0, 0, 1, 1], [], []>} : vector<128x108xbf16>, vector<108x128xbf16>, vector<128x128xf32> -> vector<128x128xf32>
      %28 = arith.addf %19, %27 : vector<128x128xf32>
      %c0_16 = arith.constant 0 : index
      %c0_17 = arith.constant 0 : index
      %29 = vector.load %arg4[%c0_16, %c0_17] : memref<1x128xf32, #tpu.memory_space<vmem>>, vector<1x128xf32>
      %30 = vector.broadcast %29 : vector<1x128xf32> to vector<128x128xf32>
      %31 = arith.addf %28, %30 : vector<128x128xf32>
      %32 = vector.extract_strided_slice %31 {offsets = [0, 0], sizes = [128, 96], strides = [1, 1]} : vector<128x128xf32> to vector<128x96xf32>
      %33 = arith.negf %32 : vector<128x96xf32>
      %34 = math.exp %33 : vector<128x96xf32>
      %cst_18 = arith.constant 1.000000e+00 : f32
      %35 = vector.broadcast %cst_18 : f32 to vector<128x96xf32>
      %36 = arith.addf %35, %34 : vector<128x96xf32>
      %37 = arith.divf %35, %36 : vector<128x96xf32>
      %38 = vector.extract_strided_slice %31 {offsets = [0, 96], sizes = [128, 32], strides = [1, 1]} : vector<128x128xf32> to vector<128x32xf32>
      %39 = math.tanh %38 : vector<128x32xf32>
      %40 = vector.extract_strided_slice %37 {offsets = [0, 0], sizes = [128, 32], strides = [1, 1]} : vector<128x96xf32> to vector<128x32xf32>
      %41 = vector.extract_strided_slice %37 {offsets = [0, 32], sizes = [128, 32], strides = [1, 1]} : vector<128x96xf32> to vector<128x32xf32>
      %42 = vector.extract_strided_slice %37 {offsets = [0, 64], sizes = [128, 32], strides = [1, 1]} : vector<128x96xf32> to vector<128x32xf32>
      %c0_19 = arith.constant 0 : index
      %43 = arith.index_cast %2 : i32 to index
      %c0_20 = arith.constant 0 : index
      %44 = vector.load %arg2[%c0_19, %43, %c0_20] : memref<1x256x32xf32, #tpu.memory_space<vmem>>, vector<1x128x32xf32>
      %45 = vector.shape_cast %44 : vector<1x128x32xf32> to vector<128x32xf32>
      %46 = arith.mulf %41, %45 : vector<128x32xf32>
      %47 = arith.mulf %40, %39 : vector<128x32xf32>
      %48 = arith.addf %46, %47 : vector<128x32xf32>
      %49 = math.tanh %48 : vector<128x32xf32>
      %50 = arith.mulf %42, %49 : vector<128x32xf32>
      %c0_21 = arith.constant 0 : index
      %51 = arith.index_cast %2 : i32 to index
      %c0_22 = arith.constant 0 : index
      %52 = vector.load %arg5[%c0_21, %51, %c0_22] : memref<1x256x32xf32, #tpu.memory_space<vmem>>, vector<1x128x32xf32>
      %53 = vector.shape_cast %52 : vector<1x128x32xf32> to vector<128x32xf32>
      %54 = vector.shape_cast %50 : vector<128x32xf32> to vector<1x128x32xf32>
      tpu.vector_store %arg5[%c0_21, %51, %c0_22], %54 {strides = array<i32>} : memref<1x256x32xf32, #tpu.memory_space<vmem>>, vector<1x128x32xf32>,
      %c0_23 = arith.constant 0 : index
      %55 = arith.index_cast %2 : i32 to index
      %c0_24 = arith.constant 0 : index
      %56 = vector.load %arg6[%c0_23, %55, %c0_24] : memref<1x256x32xf32, #tpu.memory_space<vmem>>, vector<1x128x32xf32>
      %57 = vector.shape_cast %56 : vector<1x128x32xf32> to vector<128x32xf32>
      %58 = vector.shape_cast %48 : vector<128x32xf32> to vector<1x128x32xf32>
      tpu.vector_store %arg6[%c0_23, %55, %c0_24], %58 {strides = array<i32>} : memref<1x256x32xf32, #tpu.memory_space<vmem>>, vector<1x128x32xf32>,
    }
    %c2_i32_0 = arith.constant 2 : i32
    return
  }
  func.func @transform_0(%arg0: i32) -> (i32, i32, i32) {
    %c0_i32 = arith.constant 0 : i32
    %c0_i32_0 = arith.constant 0 : i32
    %c0_i32_1 = arith.constant 0 : i32
    return %arg0, %c0_i32, %c0_i32_0 : i32, i32, i32
  }
  func.func @transform_1(%arg0: i32) -> (i32, i32, i32) {
    %c0_i32 = arith.constant 0 : i32
    %c0_i32_0 = arith.constant 0 : i32
    %c0_i32_1 = arith.constant 0 : i32
    return %arg0, %c0_i32, %c0_i32_0 : i32, i32, i32
  }
  func.func @transform_2(%arg0: i32) -> (i32, i32, i32) {
    %c0_i32 = arith.constant 0 : i32
    %c0_i32_0 = arith.constant 0 : i32
    %c0_i32_1 = arith.constant 0 : i32
    %c0_i32_2 = arith.constant 0 : i32
    return %c0_i32, %c0_i32_0, %c0_i32_1 : i32, i32, i32
  }
  func.func @transform_3(%arg0: i32) -> (i32, i32) {
    %c0_i32 = arith.constant 0 : i32
    %c0_i32_0 = arith.constant 0 : i32
    %c0_i32_1 = arith.constant 0 : i32
    return %c0_i32, %c0_i32_0 : i32, i32
  }
  func.func @transform_4(%arg0: i32) -> (i32, i32, i32) {
    %c0_i32 = arith.constant 0 : i32
    %c0_i32_0 = arith.constant 0 : i32
    %c0_i32_1 = arith.constant 0 : i32
    return %arg0, %c0_i32, %c0_i32_0 : i32, i32, i32
  }
  func.func @transform_5(%arg0: i32) -> (i32, i32, i32) {
    %c0_i32 = arith.constant 0 : i32
    %c0_i32_0 = arith.constant 0 : i32
    %c0_i32_1 = arith.constant 0 : i32
    return %arg0, %c0_i32, %c0_i32_0 : i32, i32, i32
  }
}

</mosaic_0001>

<bundles_post_ra>
// kernel: tpu_custom_call.1
= control target key start
LH: loop header
LB: loop body
LE: loop exit
PB: predicated region body
PF: predicated region fallthrough
CT: control target
= control target key end

     0   :  { %s2335_s18 = smov 0   ;;  %s2930_s0 = inlined_call_operand.vmem [shape: bf16[2,288,108], index: 0, kind: input, shape index: {}]   ;;  %s2931_s1 = inlined_call_operand.vmem [shape: f32[2,256,32], index: 1, kind: input, shape index: {}]   ;;  %s2932_s2 = inlined_call_operand.vmem [shape: bf16[3,108,128], index: 2, kind: input, shape index: {}]   ;;  %s2933_s3 = inlined_call_operand.vmem [shape: f32[1,128], index: 3, kind: input, shape index: {}]   ;;  %s2934_s4 = inlined_call_operand.vmem [shape: f32[2,256,32], index: 4, kind: output, shape index: {0}]   ;;  %s2935_s5 = inlined_call_operand.vmem [shape: f32[2,256,32], index: 5, kind: output, shape index: {1}]  }
   0x1 LB: > { %s1773_s19 = sadd.s32 4294967295, %s2296_s18   ;;  %p1777_p0 = scmp.ge.s32.totalorder %s2296_s18, 1  ;;  %s2296_s18 = sphi %s2335_s18, %s16_s18  }
   0x2   : > { %p200_p1 = scmp.lt.s32.totalorder %s2296_s18, 3 }
   0x4   : > { %p201_p2 = pnand %p1777_p0, %p200_p1 }
   0x5   : > { %p238_p3 = scmp.lt.s32.totalorder (!%p201_p2), %s1773_s19, 1  ;;  %s2362_s9 = smov (!%p201_p2), 0  }
   0x6   : > { %204 = sbr.rel (%p201_p2) target bundleno = 831 (0x33f), region = 36 }
   0xd   : > { %s2937_s19 = smov (!%p238_p3, %s1773_s19), 1 }
   0xe   : > { %s2093_s20 = smul.u32 144, %s2937_s19  ;;  %s2343_s21 = sshll.u32 %s2937_s19, 8 }
   0xf   : > { %s247_s24 = scalar_lea.vmem %s2931_s1, %s2343_s21  ;;  %s252_s27 = scalar_lea.vmem %s2934_s4, %s2343_s21 }
  0x10   : > { %s2356_s30 = scalar_lea.vmem %s2930_s0, %s2093_s20  ;;  %s257_s8 = scalar_lea.vmem %s2935_s5, %s2343_s21 }
  0x11 LB: >> { %v2113_v0 = vld [vmem:[%s2932_s2 + $0x38] sm:$0xff]   ;;  %v2114_v1 = vld [vmem:[%s2932_s2] sm:$0xff]   ;;  %s2377_s16 = sshll.u32 %s2300_s9, 7  ;;  %v2116_v3 = vld [vmem:[%s2932_s2 + $0x8] sm:$0xff]   ;;  %vm417_vm0 = vcmask 883712   ;;  %vm442_vm1 = vcmask 1045504   ;;  %s2300_s9 = sphi %s2362_s9, %s264_s9  }
  0x12   : >> { %1953 = vmatprep.subr.bf16.mxu1 %v2113_v0  ;;  %v2115_v2 = vld [vmem:[%s2932_s2 + $0x40] sm:$0xff]   ;;  %1983 = vmatprep.subr.bf16.mxu0 %v2114_v1  ;;  %s300_s20 = sadd.s32 16, %s2377_s16  ;;  %v2117_v4 = vld [vmem:[%s2932_s2 + $0x48] sm:$0xff]   ;;  %v2118_v5 = vld [vmem:[%s2932_s2 + $0x10] sm:$0xff]   ;;  %s266_s29 = sshra.s32 %s2377_s16, 3  ;;  %vm1558_vm2 = vcmask 261120  }
  0x13   : >> { %1954 = vmatpush3.bf16.msra.mxu1 %v2113_v0  ;;  %1984 = vmatpush3.bf16.msra.mxu0 %v2114_v1  ;;  %s301_s28 = sshra.s32 %s300_s20, 3  ;;  %v2119_v6 = vld [vmem:[%s2932_s2 + $0x50] sm:$0xff]   ;;  %v2120_v7 = vld [vmem:[%s2932_s2 + $0x18] sm:$0xff]   ;;  %s1786_s13 = sshll.u32 %s266_s29, 2  ;;  %v2122_v9 = vld [vmem:[%s2932_s2 + $0x20] sm:$0xff]  }
  0x14   : >> { %1955 = vmatprep.subr.bf16.mxu1 %v2115_v2  ;;  %1985 = vmatprep.subr.bf16.mxu0 %v2116_v3  ;;  %s1787_s10 = sshll.u32 %s301_s28, 2  ;;  %v2121_v8 = vld [vmem:[%s2932_s2 + $0x58] sm:$0xff]   ;;  %s2403_s19 = scalar_lea.vmem %s2356_s30, %s1786_s13  ;;  %v2123_v12 = vld [vmem:[%s2932_s2 + $0x60] sm:$0xff]   ;;  %v2124_v13 = vld [vmem:[%s2932_s2 + $0x28] sm:$0xff]  }
  0x15   : >> { %s2397_s14 = scalar_lea.vmem %s2356_s30, %s1787_s10  ;;  %v2128_v11 = vld [vmem:[%s2403_s19] sm:$0xff]   ;;  %v2125_v14 = vld [vmem:[%s2932_s2 + $0x68] sm:$0x3f]   ;;  %v2126_v15 = vld [vmem:[%s2932_s2 + $0x30] sm:$0x3f]   ;;  %s748_s13 = sadd.s32 32, %s2377_s16 }
  0x16   : >> { %v2127_v10 = vld [vmem:[%s2397_s14] sm:$0xff]   ;;  %1997 = vmatprep.mubr.msk.bf16.mxu0 %vm417_vm0, %v2128_v11  ;;  %v444_v16 = vsel %vm442_vm1, %v2125_v14, 0  ;;  %v2131_v17 = vld [vmem:[%s2932_s2 + $0x70] sm:$0xff]   ;;  %v649_v18 = vsel %vm442_vm1, %v2126_v15, 0  ;;  %v2129_v19 = vld [vmem:[%s2397_s14 + $0x8] sm:$0xff]   ;;  %s749_s20 = sshra.s32 %s748_s13, 3  ;;  %s2470_s12 = scalar_lea.vmem %s247_s24, %s2377_s16 }
  0x17   : >> { %1956 = vmatpush3.bf16.msra.mxu1 %v2115_v2  ;;  %1986 = vmatpush3.bf16.msra.mxu0 %v2116_v3  ;;  %v2130_v20 = vld [vmem:[%s2403_s19 + $0x8] sm:$0xff]   ;;  %v2132_v21 = vld [vmem:[%s2932_s2 + $0x78] sm:$0xff]   ;;  %v2133_v22 = vld [vmem:[%s2397_s14 + $0x10] sm:$0xff]   ;;  %s1848_s25 = sshll.u32 %s749_s20, 2  ;;  %s2302_s17 = smov 32  }
  0x18   : >> { %1957 = vmatprep.subr.bf16.mxu1 %v2117_v4  ;;  %1987 = vmatprep.subr.bf16.mxu0 %v2118_v5  ;;  %v2134_v23 = vld [vmem:[%s2403_s19 + $0x10] sm:$0xff]   ;;  %v2137_v24 = vld [vmem:[%s2932_s2 + $0x80] sm:$0xff]   ;;  %v2135_v25 = vld [vmem:[%s2397_s14 + $0x18] sm:$0xff]   ;;  %s2452_s29 = scalar_lea.vmem %s2356_s30, %s1848_s25  ;;  %s2303_s23 = smov 96  }
  0x19   : >> { %1967 = vmatprep.mubr.msk.bf16.mxu1 %vm417_vm0, %v2127_v10  ;;  %v2136_v26 = vld [vmem:[%s2403_s19 + $0x18] sm:$0xff]   ;;  %v2138_v27 = vld [vmem:[%s2932_s2 + $0x88] sm:$0xff]   ;;  %v2139_v28 = vld [vmem:[%s2397_s14 + $0x20] sm:$0xff]   ;;  %s2814_s28 = scalar_lea.vmem %s257_s8, %s2377_s16  ;;  %s2886_s10 = scalar_lea.vmem %s252_s27, %s2377_s16 }
  0x1a   : >> { %v2140_v29 = vld [vmem:[%s2403_s19 + $0x20] sm:$0xff]   ;;  %v2143_v30 = vld [vmem:[%s2932_s2 + $0x90] sm:$0xff]   ;;  %v2141_v31 = vld [vmem:[%s2397_s14 + $0x28] sm:$0xff]   ;;  %s264_s9 = sadd.s32 1, %s2300_s9  }
  0x1b   : >> { %1958 = vmatpush3.bf16.msra.mxu1 %v2117_v4  ;;  %1988 = vmatpush3.bf16.msra.mxu0 %v2118_v5  ;;  %v2142_v32 = vld [vmem:[%s2403_s19 + $0x28] sm:$0xff]   ;;  %v2144_v33 = vld [vmem:[%s2397_s14 + $0x30] sm:$0xff]   ;;  %v2146_v35 = vld [vmem:[%s2932_s2 + $0x98] sm:$0xff]   ;;  %p261_p4 = scmp.ge.s32.totalorder %s264_s9, 2  }
  0x1c   : >> { %1959 = vmatprep.subr.bf16.mxu1 %v2119_v6  ;;  %1989 = vmatprep.subr.bf16.mxu0 %v2120_v7  ;;  %v2145_v34 = vld [vmem:[%s2403_s19 + $0x30] sm:$0xff]   ;;  %v1141_v36 = vld [vmem:[%s2470_s12] sm:$0xff]  ;;  %v1142_v37 = vld [vmem:[%s2470_s12 + $0x8] sm:$0xff] }
  0x1d   : >> { %1173 = vrot.lane.b32.xlu0 %v1141_v36, %s2302_s17  ;;  %v2149_v38 = vld [vmem:[%s2932_s2 + $0xa0] sm:$0x3f]   ;;  %v2147_v39 = vld [vmem:[%s2397_s14 + $0x38] sm:$0xff]   ;;  %1175 = vrot.lane.b32.xlu1 %v1142_v37, %s2302_s17 }
  0x1e   : >> { %v2148_v40 = vld [vmem:[%s2403_s19 + $0x38] sm:$0xff]   ;;  %v890_v41 = vsel %vm442_vm1, %v2149_v38, 0  ;;  %v2150_v42 = vld [vmem:[%s2452_s29] sm:$0xff]   ;;  %v2153_v44 = vld [vmem:[%s2452_s29 + $0x28] sm:$0xff]  }
  0x1f   : >> { %1960 = vmatpush3.bf16.msra.mxu1 %v2119_v6  ;;  %1990 = vmatpush3.bf16.msra.mxu0 %v2120_v7  ;;  %v2151_v43 = vld [vmem:[%s2452_s29 + $0x20] sm:$0xff]   ;;  %v2152_v45 = vld [vmem:[%s2452_s29 + $0x8] sm:$0xff]   ;;  %v2155_v46 = vld [vmem:[%s2452_s29 + $0x30] sm:$0xff]  }
  0x20   : >> { %1961 = vmatprep.subr.bf16.mxu1 %v2121_v8  ;;  %1991 = vmatprep.subr.bf16.mxu0 %v2122_v9  ;;  %v2154_v47 = vld [vmem:[%s2452_s29 + $0x10] sm:$0xff]   ;;  %v2157_v48 = vld [vmem:[%s2452_s29 + $0x38] sm:$0xff]  }
  0x21   : >> { %v2156_v49 = vld [vmem:[%s2452_s29 + $0x18] sm:$0xff]   ;;  %s2304_s29 = smov 64  }
  0x23   : >> { %1962 = vmatpush3.bf16.msra.mxu1 %v2121_v8  ;;  %1992 = vmatpush3.bf16.msra.mxu0 %v2122_v9 }
  0x24   : >> { %1963 = vmatprep.subr.bf16.mxu1 %v2123_v12  ;;  %1993 = vmatprep.subr.bf16.mxu0 %v2124_v13 }
  0x27   : >> { %1964 = vmatpush3.bf16.msra.mxu1 %v2123_v12  ;;  %1994 = vmatpush3.bf16.msra.mxu0 %v2124_v13 }
  0x28   : >> { %2089 = vmatprep.subr.msk.bf16.mxu1 %vm442_vm1, %v2125_v14  ;;  %2090 = vmatprep.subr.msk.bf16.mxu0 %vm442_vm1, %v2126_v15 }
  0x2b   : >> { %1966 = vmatpush3.bf16.msra.mxu1 %v444_v16  ;;  %1996 = vmatpush3.bf16.msra.mxu0 %v649_v18  ;;  %v2517_v18 = vld [vmem:[%s2933_s3] ss:$0 sm:$0xff] }
  0x2c   : >> { %2043 = vmatprep.subr.bf16.mxu1 %v2131_v17  ;;  %2013 = vmatprep.subr.bf16.mxu0 %v2131_v17 }
  0x2e   : >> { %1968 = vmatmul.mubr.msk.bf16.vlgmr.msra.gmra.mrb[0].mxu1 %vm417_vm0, %v2129_v19  ;;  %1998 = vmatmul.mubr.msk.bf16.vlgmr.msra.gmra.mrb[0].mxu0 %vm417_vm0, %v2130_v20 }
  0x2f   : >> { %2050 = vmatpush3.bf16.msra.mxu1 %v2131_v17  ;;  %2014 = vmatpush3.bf16.msra.mxu0 %v2131_v17 }
  0x30   : >> { %2044 = vmatprep.subr.bf16.mxu1 %v2132_v21  ;;  %2015 = vmatprep.subr.bf16.mxu0 %v2132_v21 }
  0x31   : >> { %1971 = vmatprep.mubr.msk.bf16.mxu1 %vm417_vm0, %v2133_v22  ;;  %2001 = vmatprep.mubr.msk.bf16.mxu0 %vm417_vm0, %v2134_v23 }
  0x33   : >> { %2051 = vmatpush3.bf16.msra.mxu1 %v2132_v21  ;;  %2016 = vmatpush3.bf16.msra.mxu0 %v2132_v21 }
  0x34   : >> { %2045 = vmatprep.subr.bf16.mxu1 %v2137_v24  ;;  %2017 = vmatprep.subr.bf16.mxu0 %v2137_v24 }
  0x36   : >> { %1972 = vmatmul.mubr.msk.bf16.gmra.mrb[4].mxu1 %vm417_vm0, %v2135_v25  ;;  %2002 = vmatmul.mubr.msk.bf16.gmra.mrb[4].mxu0 %vm417_vm0, %v2136_v26 }
  0x37   : >> { %2052 = vmatpush3.bf16.msra.mxu1 %v2137_v24  ;;  %2018 = vmatpush3.bf16.msra.mxu0 %v2137_v24 }
  0x38   : >> { %2046 = vmatprep.subr.bf16.mxu1 %v2138_v27  ;;  %2019 = vmatprep.subr.bf16.mxu0 %v2138_v27 }
  0x39   : >> { %1975 = vmatprep.mubr.msk.bf16.mxu1 %vm417_vm0, %v2139_v28  ;;  %2005 = vmatprep.mubr.msk.bf16.mxu0 %vm417_vm0, %v2140_v29 }
  0x3b   : >> { %2053 = vmatpush3.bf16.msra.mxu1 %v2138_v27  ;;  %2020 = vmatpush3.bf16.msra.mxu0 %v2138_v27 }
  0x3c   : >> { %2047 = vmatprep.subr.bf16.mxu1 %v2143_v30  ;;  %2021 = vmatprep.subr.bf16.mxu0 %v2143_v30 }
  0x3e   : >> { %1976 = vmatmul.mubr.msk.bf16.gmra.mrb[8].mxu1 %vm417_vm0, %v2141_v31  ;;  %2006 = vmatmul.mubr.msk.bf16.gmra.mrb[8].mxu0 %vm417_vm0, %v2142_v32 }
  0x3f   : >> { %2054 = vmatpush3.bf16.msra.mxu1 %v2143_v30  ;;  %2022 = vmatpush3.bf16.msra.mxu0 %v2143_v30 }
  0x40   : >> { %1979 = vmatprep.mubr.msk.bf16.mxu1 %vm417_vm0, %v2144_v33  ;;  %2009 = vmatprep.mubr.msk.bf16.mxu0 %vm417_vm0, %v2145_v34 }
  0x41   : >> { %2023 = vmatprep.subr.bf16.mxu0 %v2146_v35  ;;  %2048 = vmatprep.subr.bf16.mxu1 %v2146_v35 }
  0x43   : >> { %2055 = vmatpush3.bf16.msra.mxu1 %v2146_v35  ;;  %2024 = vmatpush3.bf16.msra.mxu0 %v2146_v35 }
  0x44   : >> { %2092 = vmatprep.subr.msk.bf16.mxu1 %vm442_vm1, %v2149_v38  ;;  %2091 = vmatprep.subr.msk.bf16.mxu0 %vm442_vm1, %v2149_v38 }
  0x46   : >> { %1980 = vmatmul.mubr.msk.bf16.gmra.mrb[12].mxu1 %vm417_vm0, %v2147_v39  ;;  %2010 = vmatmul.mubr.msk.bf16.gmra.mrb[12].mxu0 %vm417_vm0, %v2148_v40 }
  0x47   : >> { %2056 = vmatpush3.bf16.msra.mxu1 %v890_v41  ;;  %2026 = vmatpush3.bf16.msra.mxu0 %v890_v41 }
  0x48   : >> { %2027 = vmatprep.mubr.msk.bf16.mxu0 %vm417_vm0, %v2150_v42  ;;  %2035 = vmatprep.mubr.msk.bf16.mxu1 %vm417_vm0, %v2151_v43 }
  0x4e   : >> { %2036 = vmatmul.mubr.msk.bf16.vlgmr.msra.gmra.mrb[16].mxu1 %vm417_vm0, %v2153_v44  ;;  %2028 = vmatmul.mubr.msk.bf16.vlgmr.msra.gmra.mrb[0].mxu0 %vm417_vm0, %v2152_v45 }
  0x4f   : >> { %2039 = vmatprep.mubr.msk.bf16.mxu1 %vm417_vm0, %v2155_v46  ;;  %2031 = vmatprep.mubr.msk.bf16.mxu0 %vm417_vm0, %v2154_v47 }
  0x56   : >> { %2040 = vmatmul.mubr.msk.bf16.gmra.mrb[20].mxu1 %vm417_vm0, %v2157_v48  ;;  %2032 = vmatmul.mubr.msk.bf16.gmra.mrb[4].mxu0 %vm417_vm0, %v2156_v49 }
 0x101   : >> { %v1969_v50 = vpop.f32.mrb[0].mxu1 }
 0x102   : >> { %v480_v51 = vpop.f32.mrb[1].mxu1 }
 0x103   : >> { %v1970_v52 = vpop.f32.mrb[2].mxu1 }
 0x104   : >> { %v483_v53 = vpop.f32.mrb[3].mxu1 }
 0x109   : >> { %v1973_v54 = vpop.f32.mrb[4].mxu1 }
 0x10a   : >> { %v496_v55 = vpop.f32.mrb[5].mxu1 }
 0x10b   : >> { %v1974_v56 = vpop.f32.mrb[6].mxu1 }
 0x10c   : >> { %v2512_v57 = vpop.f32.mrb[7].mxu1 }
 0x111   : >> { %v1977_v58 = vpop.f32.mrb[8].mxu1  ;;  %v2007_v59 = vpop.f32.mrb[8].mxu0 }
 0x112   : >> { %v512_v60 = vpop.f32.mrb[9].mxu1  ;;  %v726_v61 = vadd.f32 %v2007_v59, %v1977_v58  ;;  %v717_v62 = vpop.f32.mrb[9].mxu0 }
 0x113   : >> { %v1978_v63 = vpop.f32.mrb[10].mxu1  ;;  %v718_v0 = vadd.f32 %v717_v62, %v512_v60  ;;  %v2008_v1 = vpop.f32.mrb[10].mxu0 }
 0x114   : >> { %v515_v2 = vpop.f32.mrb[11].mxu1  ;;  %v729_v3 = vadd.f32 %v2008_v1, %v1978_v63  ;;  %v720_v4 = vpop.f32.mrb[11].mxu0 }
 0x115   : >> { %v721_v5 = vadd.f32 %v720_v4, %v515_v2 }
 0x119   : >> { %v1981_v6 = vpop.f32.mrb[12].mxu1  ;;  %v2011_v7 = vpop.f32.mrb[12].mxu0 }
 0x11a   : >> { %v528_v8 = vpop.f32.mrb[13].mxu1  ;;  %v742_v9 = vadd.f32 %v2011_v7, %v1981_v6  ;;  %v733_v10 = vpop.f32.mrb[13].mxu0 }
 0x11b   : >> { %v1982_v11 = vpop.f32.mrb[14].mxu1  ;;  %v734_v12 = vadd.f32 %v733_v10, %v528_v8  ;;  %v2012_v13 = vpop.f32.mrb[14].mxu0 }
 0x11c   : >> { %v531_v14 = vpop.f32.mrb[15].mxu1  ;;  %v745_v15 = vadd.f32 %v2012_v13, %v1982_v11  ;;  %v736_v16 = vpop.f32.mrb[15].mxu0 }
 0x11d   : >> { %v737_v17 = vadd.f32 %v736_v16, %v531_v14  ;;  %v1143_v16 = vld [vmem:[%s2470_s12 + $0x10] sm:$0xff] }
 0x121   : >> { %v2037_v19 = vpop.f32.mrb[16].mxu1  ;;  %v2029_v20 = vpop.f32.mrb[0].mxu0 }
 0x122   : >> { %v999_v21 = vadd.f32 %v2037_v19, %v726_v61  ;;  %v958_v22 = vpop.f32.mrb[17].mxu1  ;;  %v2057_v23 = vadd.f32 %v2029_v20, %v1969_v50  ;;  %v926_v24 = vpop.f32.mrb[1].mxu0  ;;  %v1147_v20 = vld [vmem:[%s2470_s12 + $0x30] sm:$0xff] }
 0x123   : >> { %v997_v25 = vadd.f32 %v958_v22, %v718_v0  ;;  %v2038_v26 = vpop.f32.mrb[18].mxu1  ;;  %v2058_v28 = vadd.f32 %v926_v24, %v480_v51  ;;  %v2030_v29 = vpop.f32.mrb[2].mxu0  ;;  %v1144_v22 = vld [vmem:[%s2470_s12 + $0x18] sm:$0xff]  ;;  %v1146_v24 = vld [vmem:[%s2470_s12 + $0x28] sm:$0xff] }
 0x124   : >> { %v2520_v27 = vadd.f32 %v2517_v18, %v999_v21  ;;  %v1000_v30 = vadd.f32 %v2038_v26, %v729_v3  ;;  %v961_v31 = vpop.f32.mrb[19].mxu1  ;;  %v2523_v32 = vadd.f32 %v2057_v23, %v2517_v18  ;;  %v2059_v33 = vadd.f32 %v2030_v29, %v1970_v52  ;;  %v929_v34 = vpop.f32.mrb[3].mxu0  ;;  %v1149_v23 = vld [vmem:[%s2470_s12 + $0x40] sm:$0xff]  ;;  %v1148_v26 = vld [vmem:[%s2470_s12 + $0x38] sm:$0xff]  ;;  %v1150_v29 = vld [vmem:[%s2470_s12 + $0x48] sm:$0xff] }
 0x125   : >> { %v998_v35 = vadd.f32 %v961_v31, %v721_v5  ;;  %v2528_v36 = vadd.f32 %v2058_v28, %v2517_v18  ;;  %v2060_v37 = vadd.f32 %v929_v34, %v483_v53  ;;  %v2531_v39 = vadd.f32 %v2517_v18, %v997_v25  ;;  %v1151_v25 = vld [vmem:[%s2470_s12 + $0x50] sm:$0xff]  ;;  %v1153_v28 = vld [vmem:[%s2470_s12 + $0x60] sm:$0xff]  ;;  %v1152_v31 = vld [vmem:[%s2470_s12 + $0x58] sm:$0xff] }
 0x126   : >> { %2158 = vtanh.f32 %v2520_v27  ;;  %v2535_v43 = vadd.f32 %v2059_v33, %v2517_v18  ;;  %v2539_v53 = vadd.f32 %v2517_v18, %v1000_v30  ;;  %v1155_v30 = vld [vmem:[%s2470_s12 + $0x70] sm:$0xff]  ;;  %v1154_v33 = vld [vmem:[%s2470_s12 + $0x68] sm:$0xff]  ;;  %v1156_v34 = vld [vmem:[%s2470_s12 + $0x78] sm:$0xff] }
 0x127   : >> { %2160 = vtanh.f32 %v2523_v32  ;;  %v2543_v59 = vadd.f32 %v2060_v37, %v2517_v18  ;;  %v1897_v37 = vmul.f32 -1.442695, %v2520_v27 }
 0x128   : >> { %2162 = vtanh.f32 %v2528_v36 }
 0x129   : >> { %v2041_v38 = vpop.f32.mrb[20].mxu1  ;;  %v2033_v40 = vpop.f32.mrb[4].mxu0  ;;  %2164 = vtanh.f32 %v2531_v39 }
 0x12a   : >> { %v1003_v41 = vadd.f32 %v2041_v38, %v742_v9  ;;  %v974_v42 = vpop.f32.mrb[21].mxu1  ;;  %v2061_v44 = vadd.f32 %v2033_v40, %v1973_v54  ;;  %v942_v45 = vpop.f32.mrb[5].mxu0  ;;  %2166 = vtanh.f32 %v2535_v43  ;;  %v1887_v38 = vmul.f32 -1.442695, %v2528_v36 }
 0x12b   : >> { %v1001_v46 = vadd.f32 %v974_v42, %v734_v12  ;;  %v2042_v47 = vpop.f32.mrb[22].mxu1  ;;  %v2062_v48 = vadd.f32 %v942_v45, %v496_v55  ;;  %v2034_v49 = vpop.f32.mrb[6].mxu0  ;;  %2168 = vtanh.f32 %v2539_v53  ;;  %v1890_v40 = vmul.f32 -1.442695, %v2535_v43 }
 0x12c   : >> { %v977_v50 = vpop.f32.mrb[23].mxu1  ;;  %v2063_v51 = vadd.f32 %v2034_v49, %v1974_v56  ;;  %v945_v52 = vpop.f32.mrb[7].mxu0  ;;  %v1004_v58 = vadd.f32 %v2042_v47, %v745_v15  ;;  %2170 = vtanh.f32 %v2543_v59  ;;  %v2551_v56 = vadd.f32 %v2517_v18, %v998_v35 }
 0x12d   : >> { %v2064_v60 = vadd.f32 %v945_v52, %v2512_v57  ;;  %v1002_v55 = vadd.f32 %v977_v50, %v737_v17  ;;  %v2556_v57 = vadd.f32 %v2061_v44, %v2517_v18  ;;  %v2562_v2 = vadd.f32 %v2517_v18, %v1003_v41  ;;  %v2637_v52 = vpop.permute.xlu0 %1173 }
 0x12e   : >> { %2172 = vtanh.f32 %v2551_v56  ;;  %v2568_v4 = vadd.f32 %v2062_v48, %v2517_v18  ;;  %v2571_v6 = vadd.f32 %v2517_v18, %v1001_v46  ;;  %v2576_v7 = vadd.f32 %v2063_v51, %v2517_v18 }
 0x12f   : >> { %2174 = vtanh.f32 %v2556_v57  ;;  %v2582_v9 = vadd.f32 %v2517_v18, %v1004_v58  ;;  %v2587_v11 = vadd.f32 %v2064_v60, %v2517_v18  ;;  %v2592_v13 = vadd.f32 %v2517_v18, %v1002_v55  ;;  %v1145_v18 = vld [vmem:[%s2470_s12 + $0x20] sm:$0xff]  ;;  %v2639_v58 = vpop.permute.xlu1 %1175 }
 0x130   : >> { %v2159_v54 = vpop.eup %2158  ;;  %2176 = vtanh.f32 %v2562_v2  ;;  %v1889_v35 = vmul.f32 -1.442695, %v2523_v32  ;;  %v1895_v41 = vmul.f32 -1.442695, %v2531_v39  ;;  %v1898_v42 = vmul.f32 -1.442695, %v2539_v53 }
 0x131   : >> { %v2161_v61 = vpop.eup %2160  ;;  %1273 = vrot.lane.b32.xlu0 %v2159_v54, %s2302_s17  ;;  %2178 = vtanh.f32 %v2568_v4  ;;  %v1888_v45 = vmul.f32 -1.442695, %v2543_v59  ;;  %v1896_v27 = vmul.f32 -1.442695, %v2551_v56  ;;  %v1893_v43 = vmul.f32 -1.442695, %v2556_v57 }
 0x132   : >> { %1257 = vrot.lane.b32.xlu1 %v2161_v61, %s2302_s17  ;;  %v2163_v62 = vpop.eup %2162  ;;  %2180 = vtanh.f32 %v2571_v6  ;;  %v1891_v60 = vmul.f32 -1.442695, %v2568_v4 }
 0x133   : >> { %v2165_v63 = vpop.eup %2164  ;;  %2182 = vtanh.f32 %v2576_v7 }
 0x134   : >> { %v2167_v0 = vpop.eup %2166  ;;  %2184 = vtanh.f32 %v2582_v9 }
 0x135   : >> { %1253 = vrot.lane.b32.xlu0 %v2163_v62, %s2302_s17  ;;  %v2169_v1 = vpop.eup %2168  ;;  %2186 = vtanh.f32 %v2587_v11 }
 0x136   : >> { %1259 = vrot.lane.b32.xlu1 %v2167_v0, %s2302_s17  ;;  %v2171_v3 = vpop.eup %2170  ;;  %2188 = vtanh.f32 %v2592_v13 }
 0x137   : >> { %2190 = vpow2.f32 %v1889_v35 }
 0x138   : >> { %v2173_v5 = vpop.eup %2172  ;;  %2192 = vpow2.f32 %v1897_v37 }
 0x139   : >> { %1269 = vrot.lane.b32.xlu0 %v2165_v63, %s2302_s17  ;;  %v2175_v8 = vpop.eup %2174  ;;  %2194 = vpow2.f32 %v1887_v38  ;;  %v1899_v63 = vmul.f32 -1.442695, %v2571_v6 }
 0x13a   : >> { %1275 = vrot.lane.b32.xlu1 %v2169_v1, %s2302_s17  ;;  %v2177_v10 = vpop.eup %2176  ;;  %2196 = vpow2.f32 %v1890_v40  ;;  %v1894_v1 = vmul.f32 -1.442695, %v2576_v7 }
 0x13b   : >> { %v2179_v12 = vpop.eup %2178  ;;  %2198 = vpow2.f32 %v1895_v41 }
 0x13c   : >> { %v2181_v14 = vpop.eup %2180  ;;  %2200 = vpow2.f32 %v1898_v42 }
 0x13d   : >> { %1255 = vrot.lane.b32.xlu0 %v2171_v3, %s2302_s17  ;;  %v2183_v15 = vpop.eup %2182  ;;  %2202 = vpow2.f32 %v1888_v45 }
 0x13e   : >> { %1271 = vrot.lane.b32.xlu1 %v2173_v5, %s2302_s17  ;;  %v2185_v17 = vpop.eup %2184 }
 0x13f   : >> { %v2187_v19 = vpop.eup %2186 }
 0x140   : >> { %v2189_v21 = vpop.eup %2188 }
 0x141   : >> { %1265 = vrot.lane.b32.xlu0 %v2175_v8, %s2302_s17  ;;  %v2191_v44 = vpop.eup %2190  ;;  %v1901_v8 = vmul.f32 -1.442695, %v2562_v2 }
 0x142   : >> { %1267 = vrot.lane.b32.xlu1 %v2183_v15, %s2302_s17  ;;  %v2193_v32 = vpop.eup %2192  ;;  %v1078_v46 = vadd.f32 1.0, %v2191_v44 }
 0x143   : >> { %v1086_v47 = vadd.f32 1.0, %v2193_v32  ;;  %v2195_v36 = vpop.eup %2194 }
 0x144   : >> { %2204 = vrcp.f32 %v1078_v46  ;;  %v2197_v39 = vpop.eup %2196  ;;  %v1076_v49 = vadd.f32 1.0, %v2195_v36 }
 0x145   : >> { %1281 = vrot.lane.b32.xlu0 %v2177_v10, %s2302_s17  ;;  %2206 = vpow2.f32 %v1896_v27  ;;  %v2199_v48 = vpop.eup %2198  ;;  %v1079_v51 = vadd.f32 1.0, %v2197_v39 }
 0x146   : >> { %1283 = vrot.lane.b32.xlu1 %v2185_v17, %s2302_s17  ;;  %2208 = vrcp.f32 %v1086_v47  ;;  %v2201_v50 = vpop.eup %2200  ;;  %v1084_v53 = vadd.f32 1.0, %v2199_v48 }
 0x147   : >> { %2210 = vpow2.f32 %v1893_v43  ;;  %v2203_v59 = vpop.eup %2202  ;;  %v1087_v54 = vadd.f32 1.0, %v2201_v50 }
 0x148   : >> { %2212 = vrcp.f32 %v1076_v49  ;;  %v1077_v56 = vadd.f32 1.0, %v2203_v59 }
 0x149   : >> { %1261 = vrot.lane.b32.xlu0 %v2179_v12, %s2302_s17  ;;  %2214 = vrcp.f32 %v1079_v51 }
 0x14a   : >> { %1263 = vrot.lane.b32.xlu1 %v2187_v19, %s2302_s17  ;;  %2216 = vrcp.f32 %v1084_v53  ;;  %v1892_v19 = vmul.f32 -1.442695, %v2587_v11 }
 0x14b   : >> { %2218 = vrcp.f32 %v1087_v54 }
 0x14c   : >> { %2220 = vpow2.f32 %v1891_v60 }
 0x14d   : >> { %1277 = vrot.lane.b32.xlu0 %v2181_v14, %s2302_s17  ;;  %2222 = vrcp.f32 %v1077_v56 }
 0x14e   : >> { %1279 = vrot.lane.b32.xlu1 %v2189_v21, %s2302_s17  ;;  %v2642_v55 = vpop.eup %2204  ;;  %2224 = vpow2.f32 %v1899_v63 }
 0x14f   : >> { %v2207_v0 = vpop.eup %2206  ;;  %2226 = vpow2.f32 %v1894_v1 }
 0x150   : >> { %v2647_v3 = vpop.eup %2208  ;;  %v1085_v12 = vadd.f32 1.0, %v2207_v0  ;;  %2228 = vpow2.f32 %v1901_v8 }
 0x151   : >> { %1177 = vrot.lane.b32.xlu0 %v1143_v16, %s2302_s17  ;;  %v2211_v4 = vpop.eup %2210 }
 0x152   : >> { %1179 = vrot.lane.b32.xlu1 %v1144_v22, %s2302_s17  ;;  %v2652_v6 = vpop.eup %2212  ;;  %v1082_v14 = vadd.f32 1.0, %v2211_v4  ;;  %2230 = vrcp.f32 %v1085_v12 }
 0x153   : >> { %v2655_v7 = vpop.eup %2214 }
 0x154   : >> { %v2659_v2 = vpop.eup %2216  ;;  %2232 = vrcp.f32 %v1082_v14 }
 0x155   : >> { %1181 = vrot.lane.b32.xlu0 %v1145_v18, %s2302_s17  ;;  %2234 = vpow2.f32 %v1892_v19 }
 0x156   : >> { %1183 = vrot.lane.b32.xlu1 %v1146_v24, %s2302_s17 }
 0x159   : >> { %1185 = vrot.lane.b32.xlu0 %v1147_v20, %s2302_s17  ;;  %v2662_v20 = vpop.eup %2218 }
 0x15a   : >> { %1187 = vrot.lane.b32.xlu1 %v1148_v26, %s2302_s17  ;;  %v2221_v21 = vpop.eup %2220 }
 0x15b   : >> { %v2668_v26 = vpop.eup %2222 }
 0x15c   : >> { %v2225_v11 = vpop.eup %2224 }
 0x15d   : >> { %1189 = vrot.lane.b32.xlu0 %v1149_v23, %s2302_s17 }
 0x15e   : >> { %1191 = vrot.lane.b32.xlu1 %v1150_v29, %s2302_s17  ;;  %v1080_v29 = vadd.f32 1.0, %v2221_v21 }
 0x161   : >> { %1193 = vrot.lane.b32.xlu0 %v1151_v25, %s2302_s17 }
 0x162   : >> { %1195 = vrot.lane.b32.xlu1 %v1152_v31, %s2302_s17  ;;  %v2227_v31 = vpop.eup %2226 }
 0x163   : >> { %v2229_v37 = vpop.eup %2228  ;;  %v1083_v38 = vadd.f32 1.0, %v2227_v31 }
 0x165   : >> { %1197 = vrot.lane.b32.xlu0 %v1153_v28, %s2302_s17  ;;  %v1900_v28 = vmul.f32 -1.442695, %v2592_v13  ;;  %v2676_v13 = vpop.eup %2230 }
 0x166   : >> { %1199 = vrot.lane.b32.xlu1 %v1154_v33, %s2302_s17  ;;  %v1902_v33 = vmul.f32 -1.442695, %v2582_v9  ;;  %v2678_v40 = vpop.eup %2232  ;;  %v1090_v9 = vadd.f32 1.0, %v2229_v37  ;;  %v1221_v37 = vmul.f32 %v2652_v6, %v2637_v52 }
 0x167   : >> { %2236 = vpow2.f32 %v1900_v28  ;;  %v2235_v45 = vpop.eup %2234 }
 0x168   : >> { %2238 = vrcp.f32 %v1080_v29  ;;  %v1081_v46 = vadd.f32 1.0, %v2235_v45 }
 0x169   : >> { %1201 = vrot.lane.b32.xlu0 %v1155_v30, %s2302_s17  ;;  %2240 = vpow2.f32 %v1902_v33 }
 0x16a   : >> { %1203 = vrot.lane.b32.xlu1 %v1156_v34, %s2302_s17  ;;  %v1088_v34 = vadd.f32 1.0, %v2225_v11 }
 0x16c   : >> { %2242 = vrcp.f32 %v1088_v34 }
 0x16d   : >> { %2244 = vrcp.f32 %v1083_v38 }
 0x16e   : >> { %2246 = vrcp.f32 %v1090_v9 }
 0x16f   : >> { %2248 = vrcp.f32 %v1081_v46 }
 0x171   : >> { %v2237_v27 = vpop.eup %2236 }
 0x172   : >> { %v2684_v47 = vpop.eup %2238  ;;  %v1089_v48 = vadd.f32 1.0, %v2237_v27 }
 0x173   : >> { %v2241_v39 = vpop.eup %2240 }
 0x174   : >> { %v1091_v60 = vadd.f32 1.0, %v2241_v39  ;;  %2250 = vrcp.f32 %v1089_v48  ;;  %v1222_v39 = vmul.f32 %v2668_v26, %v2639_v58 }
 0x176   : >> { %v2687_v49 = vpop.eup %2242  ;;  %2252 = vrcp.f32 %v1091_v60 }
 0x177   : >> { %v2690_v50 = vpop.eup %2244 }
 0x1a3   : >> { %v1274_v61 = vpop.permute.xlu0 %1273 }
 0x1a4   : >> { %v1258_v62 = vpop.permute.xlu1 %1257  ;;  %v1311_v10 = vmul.f32 %v2647_v3, %v1274_v61  ;;  %v2696_v61 = vpop.eup %2246 }
 0x1a5   : >> { %v1303_v57 = vmul.f32 %v2642_v55, %v1258_v62  ;;  %v2700_v63 = vpop.eup %2248 }
 0x1a6   : >> { %v2704_v1 = vpop.eup %2250 }
 0x1a7   : >> { %1337 = vrot.lane.b32.xlu0 %v1303_v57, %s2302_s17  ;;  %v1254_v5 = vpop.permute.xlu0 %1253  ;;  %v2708_v8 = vpop.eup %2252 }
 0x1a8   : >> { %v1260_v15 = vpop.permute.xlu1 %1259  ;;  %v1301_v17 = vmul.f32 %v2652_v6, %v1254_v5 }
 0x1a9   : >> { %v1304_v18 = vmul.f32 %v2655_v7, %v1260_v15 }
 0x1ab   : >> { %1353 = vrot.lane.b32.xlu0 %v1311_v10, %s2302_s17  ;;  %v1270_v16 = vpop.permute.xlu0 %1269  ;;  %1339 = vrot.lane.b32.xlu1 %v1304_v18, %s2302_s17 }
 0x1ac   : >> { %v1276_v22 = vpop.permute.xlu1 %1275  ;;  %v1309_v25 = vmul.f32 %v2659_v2, %v1270_v16 }
 0x1ad   : >> { %v1312_v24 = vmul.f32 %v2662_v20, %v1276_v22 }
 0x1af   : >> { %1333 = vrot.lane.b32.xlu0 %v1301_v17, %s2302_s17  ;;  %v1256_v23 = vpop.permute.xlu0 %1255  ;;  %1355 = vrot.lane.b32.xlu1 %v1312_v24, %s2302_s17 }
 0x1b0   : >> { %v1302_v30 = vmul.f32 %v2668_v26, %v1256_v23  ;;  %v1272_v35 = vpop.permute.xlu1 %1271 }
 0x1b1   : >> { %v1310_v41 = vmul.f32 %v2676_v13, %v1272_v35 }
 0x1b3   : >> { %1349 = vrot.lane.b32.xlu0 %v1309_v25, %s2302_s17  ;;  %1335 = vrot.lane.b32.xlu1 %v1302_v30, %s2302_s17  ;;  %v1266_v42 = vpop.permute.xlu0 %1265 }
 0x1b4   : >> { %v1307_v44 = vmul.f32 %v2678_v40, %v1266_v42  ;;  %v1268_v51 = vpop.permute.xlu1 %1267 }
 0x1b5   : >> { %v1308_v59 = vmul.f32 %v2690_v50, %v1268_v51 }
 0x1b7   : >> { %1351 = vrot.lane.b32.xlu1 %v1310_v41, %s2302_s17  ;;  %1345 = vrot.lane.b32.xlu0 %v1307_v44, %s2302_s17  ;;  %v1282_v32 = vpop.permute.xlu0 %1281 }
 0x1b8   : >> { %v1284_v56 = vpop.permute.xlu1 %1283  ;;  %v1315_v62 = vmul.f32 %v2696_v61, %v1282_v32 }
 0x1b9   : >> { %v1316_v10 = vmul.f32 %v2708_v8, %v1284_v56 }
 0x1bb   : >> { %v1262_v36 = vpop.permute.xlu0 %1261  ;;  %1347 = vrot.lane.b32.xlu1 %v1308_v59, %s2302_s17 }
 0x1bc   : >> { %v1305_v43 = vmul.f32 %v2684_v47, %v1262_v36  ;;  %v1264_v57 = vpop.permute.xlu1 %1263 }
 0x1bd   : >> { %v1306_v0 = vmul.f32 %v2700_v63, %v1264_v57 }
 0x1be   : >> { %1341 = vrot.lane.b32.xlu0 %v1305_v43, %s2302_s17 }
 0x1bf   : >> { %v1278_v53 = vpop.permute.xlu0 %1277  ;;  %1343 = vrot.lane.b32.xlu1 %v1306_v0, %s2302_s17 }
 0x1c0   : >> { %v1313_v54 = vmul.f32 %v2687_v49, %v1278_v53  ;;  %v1280_v4 = vpop.permute.xlu1 %1279 }
 0x1c1   : >> { %v1314_v5 = vmul.f32 %v2704_v1, %v1280_v4 }
 0x1c2   : >> { %1357 = vrot.lane.b32.xlu0 %v1313_v54, %s2302_s17 }
 0x1c3   : >> { %1359 = vrot.lane.b32.xlu1 %v1314_v5, %s2302_s17  ;;  %v1178_v12 = vpop.permute.xlu0 %1177 }
 0x1c4   : >> { %v1180_v15 = vpop.permute.xlu1 %1179  ;;  %v1223_v11 = vmul.f32 %v2642_v55, %v1178_v12 }
 0x1c5   : >> { %v1224_v38 = vmul.f32 %v2655_v7, %v1180_v15 }
 0x1c6   : >> { %1361 = vrot.lane.b32.xlu0 %v1315_v62, %s2302_s17 }
 0x1c7   : >> { %1363 = vrot.lane.b32.xlu1 %v1316_v10, %s2302_s17  ;;  %v2712_v14 = vpop.permute.xlu0 %1181 }
 0x1c8   : >> { %v2714_v17 = vpop.permute.xlu1 %1183 }
 0x1cb   : >> { %v1186_v16 = vpop.permute.xlu0 %1185 }
 0x1cc   : >> { %v1188_v19 = vpop.permute.xlu1 %1187  ;;  %v1227_v54 = vmul.f32 %v2678_v40, %v1186_v16 }
 0x1cd   : >> { %v1228_v15 = vmul.f32 %v2690_v50, %v1188_v19 }
 0x1cf   : >> { %v1190_v18 = vpop.permute.xlu0 %1189 }
 0x1d0   : >> { %v1192_v22 = vpop.permute.xlu1 %1191  ;;  %v1229_v45 = vmul.f32 %v2659_v2, %v1190_v18 }
 0x1d1   : >> { %v1230_v59 = vmul.f32 %v2676_v13, %v1192_v22 }
 0x1d3   : >> { %v1194_v21 = vpop.permute.xlu0 %1193 }
 0x1d4   : >> { %v1196_v24 = vpop.permute.xlu1 %1195  ;;  %v1231_v31 = vmul.f32 %v2647_v3, %v1194_v21 }
 0x1d5   : >> { %v1232_v32 = vmul.f32 %v2662_v20, %v1196_v24 }
 0x1d7   : >> { %v2716_v23 = vpop.permute.xlu0 %1197 }
 0x1d8   : >> { %v2720_v28 = vpop.permute.xlu1 %1199 }
 0x1db   : >> { %v2718_v25 = vpop.permute.xlu0 %1201 }
 0x1dc   : >> { %v2727_v33 = vpop.permute.xlu1 %1203 }
 0x219   : >> { %v1338_v29 = vpop.permute.xlu0 %1337 }
 0x21a   : >> { %v2723_v30 = vadd.f32 %v1338_v29, %v1223_v11  ;;  %v1235_v11 = vmul.f32 %v2696_v61, %v2718_v25  ;;  %v1236_v25 = vmul.f32 %v2708_v8, %v2727_v33 }
 0x21c   : >> { %2254 = vtanh.f32 %v2723_v30 }
 0x21d   : >> { %v1354_v34 = vpop.permute.xlu0 %1353  ;;  %v1340_v41 = vpop.permute.xlu1 %1339 }
 0x21e   : >> { %v2729_v35 = vadd.f32 %v1354_v34, %v1231_v31  ;;  %v2735_v44 = vadd.f32 %v1340_v41, %v1224_v38  ;;  %v1225_v31 = vmul.f32 %v2684_v47, %v2712_v14  ;;  %v1233_v38 = vmul.f32 %v2687_v49, %v2716_v23 }
 0x220   : >> { %2256 = vtanh.f32 %v2729_v35 }
 0x221   : >> { %v1334_v42 = vpop.permute.xlu0 %1333  ;;  %2258 = vtanh.f32 %v2735_v44  ;;  %v1356_v46 = vpop.permute.xlu1 %1355 }
 0x222   : >> { %v1381_v9 = vadd.f32 %v1334_v42, %v1221_v37  ;;  %v2741_v36 = vadd.f32 %v1356_v46, %v1232_v32  ;;  %v1226_v32 = vmul.f32 %v2700_v63, %v2714_v17 }
 0x224   : >> { %1591 = vrot.lane.b32.xlu0 %v1381_v9, %s2303_s23  ;;  %2260 = vtanh.f32 %v1381_v9 }
 0x225   : >> { %v1350_v52 = vpop.permute.xlu0 %1349  ;;  %2262 = vtanh.f32 %v2741_v36  ;;  %v1336_v48 = vpop.permute.xlu1 %1335 }
 0x226   : >> { %v2255_v27 = vpop.eup %2254  ;;  %v2743_v43 = vadd.f32 %v1350_v52, %v1229_v45  ;;  %v1382_v53 = vadd.f32 %v1336_v48, %v1222_v39 }
 0x228   : >> { %1433 = vrot.lane.b32.xlu0 %v2255_v27, %s2302_s17  ;;  %2264 = vtanh.f32 %v2743_v43  ;;  %1593 = vrot.lane.b32.xlu1 %v1382_v53, %s2303_s23  ;;  %v1234_v27 = vmul.f32 %v2704_v1, %v2720_v28 }
 0x229   : >> { %2266 = vtanh.f32 %v1382_v53  ;;  %v1352_v60 = vpop.permute.xlu1 %1351  ;;  %v1346_v62 = vpop.permute.xlu0 %1345 }
 0x22a   : >> { %v2257_v51 = vpop.eup %2256  ;;  %v2754_v56 = vadd.f32 %v1352_v60, %v1230_v59  ;;  %v1387_v0 = vadd.f32 %v1346_v62, %v1227_v54 }
 0x22b   : >> { %v2259_v58 = vpop.eup %2258 }
 0x22c   : >> { %1449 = vrot.lane.b32.xlu0 %v2257_v51, %s2302_s17  ;;  %2268 = vtanh.f32 %v2754_v56  ;;  %1435 = vrot.lane.b32.xlu1 %v2259_v58, %s2302_s17 }
 0x22d   : >> { %2270 = vtanh.f32 %v1387_v0  ;;  %v1348_v18 = vpop.permute.xlu1 %1347 }
 0x22e   : >> { %v2261_v57 = vpop.eup %2260  ;;  %v1388_v24 = vadd.f32 %v1348_v18, %v1228_v15 }
 0x22f   : >> { %v2263_v4 = vpop.eup %2262 }
 0x230   : >> { %1429 = vrot.lane.b32.xlu0 %v2261_v57, %s2302_s17  ;;  %1451 = vrot.lane.b32.xlu1 %v2263_v4, %s2302_s17  ;;  %v1342_v12 = vpop.permute.xlu0 %1341  ;;  %2272 = vtanh.f32 %v1388_v24 }
 0x231   : >> { %v1385_v19 = vadd.f32 %v1342_v12, %v1225_v31  ;;  %v1344_v37 = vpop.permute.xlu1 %1343 }
 0x232   : >> { %v2265_v5 = vpop.eup %2264  ;;  %v1386_v23 = vadd.f32 %v1344_v37, %v1226_v32 }
 0x233   : >> { %v2267_v10 = vpop.eup %2266 }
 0x234   : >> { %1445 = vrot.lane.b32.xlu0 %v2265_v5, %s2302_s17  ;;  %1431 = vrot.lane.b32.xlu1 %v2267_v10, %s2302_s17  ;;  %v1358_v21 = vpop.permute.xlu0 %1357 }
 0x235   : >> { %v1393_v41 = vadd.f32 %v1358_v21, %v1233_v38  ;;  %v1360_v42 = vpop.permute.xlu1 %1359 }
 0x236   : >> { %v2269_v16 = vpop.eup %2268  ;;  %v1394_v33 = vadd.f32 %v1360_v42, %v1234_v27 }
 0x237   : >> { %v2271_v22 = vpop.eup %2270 }
 0x238   : >> { %1447 = vrot.lane.b32.xlu1 %v2269_v16, %s2302_s17  ;;  %1441 = vrot.lane.b32.xlu0 %v2271_v22, %s2302_s17  ;;  %v1362_v29 = vpop.permute.xlu0 %1361 }
 0x239   : >> { %v2769_v34 = vadd.f32 %v1362_v29, %v1235_v11  ;;  %v1364_v14 = vpop.permute.xlu1 %1363 }
 0x23a   : >> { %v2273_v9 = vpop.eup %2272  ;;  %v2779_v46 = vadd.f32 %v1364_v14, %v1236_v25 }
 0x23b   : >> { %2274 = vtanh.f32 %v2769_v34 }
 0x23c   : >> { %2276 = vtanh.f32 %v1385_v19  ;;  %1443 = vrot.lane.b32.xlu1 %v2273_v9, %s2302_s17 }
 0x23d   : >> { %2278 = vtanh.f32 %v1393_v41 }
 0x23e   : >> { %2280 = vtanh.f32 %v2779_v46 }
 0x23f   : >> { %2282 = vtanh.f32 %v1386_v23 }
 0x240   : >> { %2284 = vtanh.f32 %v1394_v33 }
 0x245   : >> { %v2275_v45 = vpop.eup %2274 }
 0x246   : >> { %1457 = vrot.lane.b32.xlu0 %v2275_v45, %s2302_s17  ;;  %v2277_v52 = vpop.eup %2276 }
 0x247   : >> { %v2279_v39 = vpop.eup %2278 }
 0x248   : >> { %v2281_v17 = vpop.eup %2280 }
 0x249   : >> { %1459 = vrot.lane.b32.xlu1 %v2281_v17, %s2302_s17  ;;  %v2283_v48 = vpop.eup %2282 }
 0x24a   : >> { %1437 = vrot.lane.b32.xlu0 %v2277_v52, %s2302_s17  ;;  %v2285_v28 = vpop.eup %2284 }
 0x24d   : >> { %1439 = vrot.lane.b32.xlu1 %v2283_v48, %s2302_s17 }
 0x24e   : >> { %1453 = vrot.lane.b32.xlu0 %v2279_v39, %s2302_s17 }
 0x251   : >> { %1455 = vrot.lane.b32.xlu1 %v2285_v28, %s2302_s17 }
 0x252   : >> { %1595 = vrot.lane.b32.xlu0 %v2723_v30, %s2303_s23 }
 0x255   : >> { %1597 = vrot.lane.b32.xlu1 %v2735_v44, %s2303_s23 }
 0x256   : >> { %1599 = vrot.lane.b32.xlu0 %v1385_v19, %s2303_s23 }
 0x259   : >> { %1601 = vrot.lane.b32.xlu1 %v1386_v23, %s2303_s23 }
 0x25a   : >> { %1603 = vrot.lane.b32.xlu0 %v1387_v0, %s2303_s23 }
 0x25d   : >> { %1605 = vrot.lane.b32.xlu1 %v1388_v24, %s2303_s23 }
 0x25e   : >> { %1607 = vrot.lane.b32.xlu0 %v2743_v43, %s2303_s23 }
 0x261   : >> { %1609 = vrot.lane.b32.xlu1 %v2754_v56, %s2303_s23 }
 0x262   : >> { %1611 = vrot.lane.b32.xlu0 %v2729_v35, %s2303_s23 }
 0x265   : >> { %1613 = vrot.lane.b32.xlu1 %v2741_v36, %s2303_s23 }
 0x266   : >> { %1615 = vrot.lane.b32.xlu0 %v1393_v41, %s2303_s23 }
 0x269   : >> { %1617 = vrot.lane.b32.xlu1 %v1394_v33, %s2303_s23 }
 0x296   : >> { %v1592_v30 = vpop.permute.xlu0 %1591 }
 0x297   : >> { %1640 = vst.msk [vmem:[%s2814_s28] sm:$0xff] %vm1558_vm2, %v1592_v30 }
 0x29a   : >> { %v1434_v35 = vpop.permute.xlu0 %1433  ;;  %v1594_v36 = vpop.permute.xlu1 %1593 }
 0x29b   : >> { %v1479_v44 = vmul.f32 %v2642_v55, %v1434_v35  ;;  %1641 = vst.msk [vmem:[%s2814_s28 + $0x8] sm:$0xff] %vm1558_vm2, %v1594_v36 }
 0x29d   : >> { %1513 = vrot.lane.b32.xlu0 %v1479_v44, %s2304_s29 }
 0x29e   : >> { %v1450_v43 = vpop.permute.xlu0 %1449  ;;  %v1436_v53 = vpop.permute.xlu1 %1435 }
 0x29f   : >> { %v1487_v51 = vmul.f32 %v2647_v3, %v1450_v43  ;;  %v1480_v54 = vmul.f32 %v2655_v7, %v1436_v53 }
 0x2a1   : >> { %1529 = vrot.lane.b32.xlu0 %v1487_v51, %s2304_s29  ;;  %1515 = vrot.lane.b32.xlu1 %v1480_v54, %s2304_s29 }
 0x2a2   : >> { %v1430_v59 = vpop.permute.xlu0 %1429  ;;  %v1452_v55 = vpop.permute.xlu1 %1451 }
 0x2a3   : >> { %v1477_v60 = vmul.f32 %v2652_v6, %v1430_v59  ;;  %v1488_v56 = vmul.f32 %v2662_v20, %v1452_v55 }
 0x2a5   : >> { %1509 = vrot.lane.b32.xlu0 %v1477_v60, %s2304_s29  ;;  %1531 = vrot.lane.b32.xlu1 %v1488_v56, %s2304_s29 }
 0x2a6   : >> { %v1446_v58 = vpop.permute.xlu0 %1445  ;;  %v1432_v3 = vpop.permute.xlu1 %1431 }
 0x2a7   : >> { %v1485_v62 = vmul.f32 %v2659_v2, %v1446_v58  ;;  %v1478_v57 = vmul.f32 %v2668_v26, %v1432_v3 }
 0x2a9   : >> { %1525 = vrot.lane.b32.xlu0 %v1485_v62, %s2304_s29  ;;  %1511 = vrot.lane.b32.xlu1 %v1478_v57, %s2304_s29 }
 0x2aa   : >> { %v1448_v6 = vpop.permute.xlu1 %1447  ;;  %v1442_v7 = vpop.permute.xlu0 %1441 }
 0x2ab   : >> { %v1486_v0 = vmul.f32 %v2676_v13, %v1448_v6  ;;  %v1483_v4 = vmul.f32 %v2678_v40, %v1442_v7 }
 0x2ad   : >> { %1527 = vrot.lane.b32.xlu1 %v1486_v0, %s2304_s29  ;;  %1521 = vrot.lane.b32.xlu0 %v1483_v4, %s2304_s29 }
 0x2ae   : >> { %v1444_v2 = vpop.permute.xlu1 %1443 }
 0x2af   : >> { %v1484_v20 = vmul.f32 %v2690_v50, %v1444_v2 }
 0x2b1   : >> { %1523 = vrot.lane.b32.xlu1 %v1484_v20, %s2304_s29 }
 0x2b8   : >> { %v1458_v5 = vpop.permute.xlu0 %1457 }
 0x2b9   : >> { %v1491_v26 = vmul.f32 %v2696_v61, %v1458_v5 }
 0x2bb   : >> { %1537 = vrot.lane.b32.xlu0 %v1491_v26, %s2304_s29  ;;  %v1460_v50 = vpop.permute.xlu1 %1459 }
 0x2bc   : >> { %v1438_v10 = vpop.permute.xlu0 %1437  ;;  %v1492_v16 = vmul.f32 %v2708_v8, %v1460_v50 }
 0x2bd   : >> { %v1481_v13 = vmul.f32 %v2684_v47, %v1438_v10 }
 0x2be   : >> { %1539 = vrot.lane.b32.xlu1 %v1492_v16, %s2304_s29 }
 0x2bf   : >> { %1517 = vrot.lane.b32.xlu0 %v1481_v13, %s2304_s29  ;;  %v1440_v47 = vpop.permute.xlu1 %1439 }
 0x2c0   : >> { %v1454_v40 = vpop.permute.xlu0 %1453 }
 0x2c1   : >> { %v1489_v12 = vmul.f32 %v2687_v49, %v1454_v40  ;;  %v1482_v49 = vmul.f32 %v2700_v63, %v1440_v47 }
 0x2c3   : >> { %1533 = vrot.lane.b32.xlu0 %v1489_v12, %s2304_s29  ;;  %1519 = vrot.lane.b32.xlu1 %v1482_v49, %s2304_s29  ;;  %v1456_v8 = vpop.permute.xlu1 %1455 }
 0x2c4   : >> { %v1596_v15 = vpop.permute.xlu0 %1595  ;;  %v1490_v21 = vmul.f32 %v2704_v1, %v1456_v8 }
 0x2c5   : >> { %1642 = vst.msk [vmem:[%s2814_s28 + $0x10] sm:$0xff] %vm1558_vm2, %v1596_v15 }
 0x2c7   : >> { %1619 = vrot.lane.b32.xlu0 %v2769_v34, %s2303_s23  ;;  %1535 = vrot.lane.b32.xlu1 %v1490_v21, %s2304_s29  ;;  %v1598_v22 = vpop.permute.xlu1 %1597 }
 0x2c8   : >> { %v1600_v61 = vpop.permute.xlu0 %1599  ;;  %1643 = vst.msk [vmem:[%s2814_s28 + $0x18] sm:$0xff] %vm1558_vm2, %v1598_v22 }
 0x2c9   : >> { %1644 = vst.msk [vmem:[%s2814_s28 + $0x20] sm:$0xff] %vm1558_vm2, %v1600_v61 }
 0x2cb   : >> { %1621 = vrot.lane.b32.xlu1 %v2779_v46, %s2303_s23  ;;  %v1602_v63 = vpop.permute.xlu1 %1601 }
 0x2cc   : >> { %v1604_v18 = vpop.permute.xlu0 %1603  ;;  %1645 = vst.msk [vmem:[%s2814_s28 + $0x28] sm:$0xff] %vm1558_vm2, %v1602_v63 }
 0x2cd   : >> { %1646 = vst.msk [vmem:[%s2814_s28 + $0x30] sm:$0xff] %vm1558_vm2, %v1604_v18 }
 0x2cf   : >> { %v1606_v11 = vpop.permute.xlu1 %1605 }
 0x2d0   : >> { %v1608_v24 = vpop.permute.xlu0 %1607  ;;  %1647 = vst.msk [vmem:[%s2814_s28 + $0x38] sm:$0xff] %vm1558_vm2, %v1606_v11 }
 0x2d1   : >> { %1648 = vst.msk [vmem:[%s2814_s28 + $0x40] sm:$0xff] %vm1558_vm2, %v1608_v24 }
 0x2d3   : >> { %v1610_v31 = vpop.permute.xlu1 %1609 }
 0x2d4   : >> { %v1612_v1 = vpop.permute.xlu0 %1611  ;;  %1649 = vst.msk [vmem:[%s2814_s28 + $0x48] sm:$0xff] %vm1558_vm2, %v1610_v31 }
 0x2d5   : >> { %1650 = vst.msk [vmem:[%s2814_s28 + $0x50] sm:$0xff] %vm1558_vm2, %v1612_v1 }
 0x2d7   : >> { %v1614_v34 = vpop.permute.xlu1 %1613 }
 0x2d8   : >> { %v1616_v29 = vpop.permute.xlu0 %1615  ;;  %1651 = vst.msk [vmem:[%s2814_s28 + $0x58] sm:$0xff] %vm1558_vm2, %v1614_v34 }
 0x2d9   : >> { %1652 = vst.msk [vmem:[%s2814_s28 + $0x60] sm:$0xff] %vm1558_vm2, %v1616_v29 }
 0x2db   : >> { %v1618_v19 = vpop.permute.xlu1 %1617 }
 0x2dc   : >> { %1653 = vst.msk [vmem:[%s2814_s28 + $0x68] sm:$0xff] %vm1558_vm2, %v1618_v19 }
 0x30f   : >> { %v1514_v37 = vpop.permute.xlu0 %1513 }
 0x310   : >> { %1561 = vst.msk [vmem:[%s2886_s10 + $0x10] sm:$0xff] %vm1558_vm2, %v1514_v37 }
 0x313   : >> { %v1530_v38 = vpop.permute.xlu0 %1529  ;;  %v1516_v41 = vpop.permute.xlu1 %1515 }
 0x314   : >> { %1569 = vst.msk [vmem:[%s2886_s10 + $0x50] sm:$0xff] %vm1558_vm2, %v1530_v38  ;;  %1562 = vst.msk [vmem:[%s2886_s10 + $0x18] sm:$0xff] %vm1558_vm2, %v1516_v41 }
 0x317   : >> { %v1510_v42 = vpop.permute.xlu0 %1509  ;;  %v1532_v9 = vpop.permute.xlu1 %1531 }
 0x318   : >> { %1559 = vst.msk [vmem:[%s2886_s10] sm:$0xff] %vm1558_vm2, %v1510_v42  ;;  %1570 = vst.msk [vmem:[%s2886_s10 + $0x58] sm:$0xff] %vm1558_vm2, %v1532_v9 }
 0x31b   : >> { %v1526_v25 = vpop.permute.xlu0 %1525  ;;  %v1512_v14 = vpop.permute.xlu1 %1511 }
 0x31c   : >> { %1567 = vst.msk [vmem:[%s2886_s10 + $0x40] sm:$0xff] %vm1558_vm2, %v1526_v25  ;;  %1560 = vst.msk [vmem:[%s2886_s10 + $0x8] sm:$0xff] %vm1558_vm2, %v1512_v14 }
 0x31f   : >> { %v1528_v45 = vpop.permute.xlu1 %1527  ;;  %v1522_v32 = vpop.permute.xlu0 %1521 }
 0x320   : >> { %1568 = vst.msk [vmem:[%s2886_s10 + $0x48] sm:$0xff] %vm1558_vm2, %v1528_v45  ;;  %1565 = vst.msk [vmem:[%s2886_s10 + $0x30] sm:$0xff] %vm1558_vm2, %v1522_v32 }
 0x323   : >> { %v1524_v46 = vpop.permute.xlu1 %1523 }
 0x324   : >> { %1566 = vst.msk [vmem:[%s2886_s10 + $0x38] sm:$0xff] %vm1558_vm2, %v1524_v46 }
 0x32d   : >> { %v1538_v23 = vpop.permute.xlu0 %1537 }
 0x32e   : >> { %1573 = vst.msk [vmem:[%s2886_s10 + $0x70] sm:$0xff] %vm1558_vm2, %v1538_v23 }
 0x330   : >> { %v1540_v33 = vpop.permute.xlu1 %1539 }
 0x331   : >> { %v1518_v52 = vpop.permute.xlu0 %1517  ;;  %1574 = vst.msk [vmem:[%s2886_s10 + $0x78] sm:$0xff] %vm1558_vm2, %v1540_v33 }
 0x332   : >> { %1563 = vst.msk [vmem:[%s2886_s10 + $0x20] sm:$0xff] %vm1558_vm2, %v1518_v52 }
 0x335   : >> { %v1534_v27 = vpop.permute.xlu0 %1533  ;;  %v1520_v17 = vpop.permute.xlu1 %1519 }
 0x336   : >> { %1571 = vst.msk [vmem:[%s2886_s10 + $0x60] sm:$0xff] %vm1558_vm2, %v1534_v27  ;;  %1564 = vst.msk [vmem:[%s2886_s10 + $0x28] sm:$0xff] %vm1558_vm2, %v1520_v17 }
 0x338   : > { %263 = sbr.rel (!%p261_p4) target bundleno = 17 (0x11), region = 96 }
 0x339   : >> { %v1620_v39 = vpop.permute.xlu0 %1619  ;;  %v1536_v48 = vpop.permute.xlu1 %1535 }
 0x33a   : >> { %1654 = vst.msk [vmem:[%s2814_s28 + $0x70] sm:$0xff] %vm1558_vm2, %v1620_v39  ;;  %1572 = vst.msk [vmem:[%s2886_s10 + $0x68] sm:$0xff] %vm1558_vm2, %v1536_v48 }
 0x33d   : >> { %v1622_v28 = vpop.permute.xlu1 %1621 }
 0x33e   : >> { %1655 = vst.msk [vmem:[%s2814_s28 + $0x78] sm:$0xff] %vm1558_vm2, %v1622_v28 }
 0x33f PF: > { %s16_s18 = sadd.s32 1, %s2296_s18  }
 0x340   : > { %p13_p5 = scmp.ge.s32.totalorder %s16_s18, 4  }
 0x342   :  { %15 = sbr.rel (!%p13_p5) target bundleno = 1 (0x1), region = 107 }

</bundles_post_ra>
